<compile_context>
chip_gen: v7x
topology: tpu7x:2x2x1
jax: 0.10.0
libtpu: 0.0.40
codegen_flags: <defaults>
</compile_context>

<pallas_src>
from functools import partial

import jax
import jax.numpy as jnp
from jax.experimental import pallas as pl
from jax.experimental.pallas import tpu as pltpu


# 3x3 tap offsets (dy, dx); conv weights are stored per tap as (9, Cout, Cin)
# in this order (equivalent to torch w[co, ci, kh, kw] with dy=kh-1, dx=kw-1).
_TAPS = tuple((dy, dx) for dy in (-1, 0, 1) for dx in (-1, 0, 1))


# ---------------------------------------------------------------------------
# Fused Pallas kernel: conv1 + ReLU + conv2 (hooked) + ReLU + GAP + FC
# ---------------------------------------------------------------------------

def _fused_forward_kernel(x_ref, w1_ref, b1_ref, w2_ref, b2_ref, wfc_ref,
                          bfc_ref, act_ref, logits_ref,
                          xpad_ref, hpad_ref, p1_ref, p2_ref, *, H, W, pad):
    """Whole GradCam backbone forward for one batch element.

    Layout: activations are (C, H*W) -- channels on sublanes, flattened
    spatial on the 128-lane axis (lane-dense).

    x_ref:      (1, Cin, H*W)
    w1_ref:     (Cmid, 9*Cin)      b1_ref:  (Cmid, 1)     (tap-stacked weights)
    w2_ref:     (Clast, 9*Cmid)    b2_ref:  (Clast, 1)
    wfc_ref:    (Clast, NCP)       bfc_ref: (1, NCP)      (NCP = NC padded to 128)
    act_ref:    (1, Clast, H*W)    hooked last_layer output (pre-ReLU)
    logits_ref: (1, 1, NCP)
    xpad_ref:   (Cin,  2*pad + H*W)   zero-haloed flat input        (scratch)
    hpad_ref:   (Cmid, 2*pad + H*W)   zero-haloed flat h1           (scratch)
    p1_ref:     (9*Cin,  H*W)         conv1 im2col patches          (scratch)
    p2_ref:     (9*Cmid, H*W)         conv2 im2col patches          (scratch)
    """
    HW = H * W
    cin = x_ref.shape[1]
    cmid = hpad_ref.shape[0]

    # Column masks (precomputed once, reused by both convs).  Row/dy checks are
    # unnecessary: the >= W+1 zero halo supplies zeros for vertical shifts.
    col = jax.lax.broadcasted_iota(jnp.int32, (1, HW), 1) % W
    mask_l = col > 0          # valid positions for dx = -1 taps
    mask_r = col < W - 1      # valid positions for dx = +1 taps

    def build_patches(src_pad_ref, patch_ref, c):
        """Write the 9 masked shifted slices into the (9*c, HW) patch scratch."""
        ml = jnp.broadcast_to(mask_l, (c, HW))   # broadcast once per conv
        mr = jnp.broadcast_to(mask_r, (c, HW))
        for t, (dy, dx) in enumerate(_TAPS):
            start = pad + dy * W + dx                      # static offset
            s = src_pad_ref[:, start:start + HW]           # (c, HW)
            if dx == -1:
                s = jnp.where(ml, s, 0.0)
            elif dx == 1:
                s = jnp.where(mr, s, 0.0)
            patch_ref[t * c:(t + 1) * c, :] = s

    # ---- halo-only zero fill (center columns are overwritten every step) ----
    xpad_ref[:, :pad] = jnp.zeros((cin, pad), jnp.float32)
    xpad_ref[:, pad + HW:] = jnp.zeros((cin, pad), jnp.float32)
    hpad_ref[:, :pad] = jnp.zeros((cmid, pad), jnp.float32)
    hpad_ref[:, pad + HW:] = jnp.zeros((cmid, pad), jnp.float32)

    # ---- conv1 + ReLU: ONE matmul, K = 9*Cin (h1 lives only in VMEM) ----
    xpad_ref[:, pad:pad + HW] = x_ref[0]                   # 128-aligned store
    build_patches(xpad_ref, p1_ref, cin)
    h1 = jnp.maximum(
        jnp.dot(w1_ref[...], p1_ref[...], preferred_element_type=jnp.float32)
        + b1_ref[...], 0.0)

    # ---- conv2 (= last_layer; hook captures its pre-ReLU output) ----
    hpad_ref[:, pad:pad + HW] = h1
    build_patches(hpad_ref, p2_ref, cmid)
    act = (jnp.dot(w2_ref[...], p2_ref[...], preferred_element_type=jnp.float32)
           + b2_ref[...])
    act_ref[0] = act.astype(act_ref.dtype)                 # lane-dense (C, HW)

    # ---- head: ReLU -> global average pool -> Linear (lane-dense logits) ----
    pooled = jnp.sum(jnp.maximum(act, 0.0), axis=1, keepdims=True) * (1.0 / HW)
    logits = (jnp.sum(pooled * wfc_ref[...], axis=0, keepdims=True)
              + bfc_ref[...])                              # (1, NCP)
    logits_ref[0] = logits.astype(logits_ref.dtype)


# ---------------------------------------------------------------------------
# Wrapper
# ---------------------------------------------------------------------------

def gradcam_forward(x_nchw, w1, b1, w2, b2, wfc, bfc):
    B, Cin, H, W = x_nchw.shape
    HW = H * W
    Cmid = w1.shape[1]
    Clast = w2.shape[1]
    NC = wfc.shape[1]
    NCP = pl.cdiv(NC, 128) * 128                # lane-dense logits slab
    pad = max(128, pl.cdiv(W + 1, 128) * 128)   # halo >= W+1, keeps the
    assert pad >= W + 1                         # center store 128-aligned

    x_flat = x_nchw.reshape(B, Cin, HW).astype(jnp.float32)   # free reshape

    # Stack the per-tap conv weights to (Cout, 9*Cin) so each conv is ONE
    # MXU matmul in the kernel (tiny one-time reshapes on 8x36 / 8x72 arrays).
    w1s = jnp.transpose(w1, (1, 0, 2)).reshape(Cmid, 9 * Cin)
    w2s = jnp.transpose(w2, (1, 0, 2)).reshape(Clast, 9 * Cmid)

    # Pad the FC weights/bias to a 128-lane slab (unmasked logits store).
    wfc_p = jnp.zeros((Clast, NCP), jnp.float32).at[:, :NC].set(wfc)
    bfc_p = jnp.zeros((1, NCP), jnp.float32).at[:, :NC].set(bfc)

    act_flat, logits_pad = pl.pallas_call(
        partial(_fused_forward_kernel, H=H, W=W, pad=pad),
        out_shape=(
            jax.ShapeDtypeStruct((B, Clast, HW), jnp.float32),
            jax.ShapeDtypeStruct((B, 1, NCP), jnp.float32),
        ),
        grid=(B,),
        in_specs=[
            pl.BlockSpec((1, Cin, HW), lambda b: (b, 0, 0)),
            pl.BlockSpec((Cmid, 9 * Cin), lambda b: (0, 0)),
            pl.BlockSpec((Cmid, 1), lambda b: (0, 0)),
            pl.BlockSpec((Clast, 9 * Cmid), lambda b: (0, 0)),
            pl.BlockSpec((Clast, 1), lambda b: (0, 0)),
            pl.BlockSpec((Clast, NCP), lambda b: (0, 0)),
            pl.BlockSpec((1, NCP), lambda b: (0, 0)),
        ],
        out_specs=(
            pl.BlockSpec((1, Clast, HW), lambda b: (b, 0, 0)),
            pl.BlockSpec((1, 1, NCP), lambda b: (b, 0, 0)),
        ),
        scratch_shapes=[
            pltpu.VMEM((Cin, HW + 2 * pad), jnp.float32),     # xpad
            pltpu.VMEM((Cmid, HW + 2 * pad), jnp.float32),    # hpad
            pltpu.VMEM((9 * Cin, HW), jnp.float32),           # conv1 patches
            pltpu.VMEM((9 * Cmid, HW), jnp.float32),          # conv2 patches
        ],
        compiler_params=pltpu.CompilerParams(
            dimension_semantics=("parallel",)),
    )(x_flat, w1s, b1, w2s, b2, wfc_p, bfc_p)

    logits = logits_pad[:, 0, :NC]                     # (B, NC)
    selected_out = act_flat.reshape(B, Clast, H, W)    # torch NCHW hook view (free)
    return logits, selected_out


# ---------------------------------------------------------------------------
# GradCamModel equivalent
# ---------------------------------------------------------------------------

class GradCamModel:
    """JAX/Pallas mirror of the PyTorch GradCamModel forward pass."""

    def __init__(self, key, cin=4, cmid=8, clast=8, num_classes=10):
        ks = jax.random.split(key, 6)
        s = 0.1
        # 3x3 conv weights stored per tap: (9, Cout, Cin), taps in _TAPS order.
        self.w1 = jax.random.normal(ks[0], (9, cmid, cin), jnp.float32) * s
        self.b1 = jax.random.normal(ks[1], (cmid, 1), jnp.float32) * s
        self.w2 = jax.random.normal(ks[2], (9, clast, cmid), jnp.float32) * s
        self.b2 = jax.random.normal(ks[3], (clast, 1), jnp.float32) * s
        self.wfc = jax.random.normal(ks[4], (clast, num_classes), jnp.float32) * s
        self.bfc = jax.random.normal(ks[5], (1, num_classes), jnp.float32) * s

    def __call__(self, x_nchw):
        # forward hook: selected_out = last_layer (conv2) output, pre-ReLU,
        # returned in torch NCHW layout.
        return gradcam_forward(x_nchw, self.w1, self.b1, self.w2, self.b2,
                               self.wfc, self.bfc)


# ---------------------------------------------------------------------------
# Pure-JAX reference (for a numerical self-check)
# ---------------------------------------------------------------------------

def _reference_forward(x_nchw, w1, b1, w2, b2, wfc, bfc):
    x = x_nchw.astype(jnp.float32)

    def conv3x3(inp, wt, bias):
        B, C, H, W = inp.shape
        xp = jnp.pad(inp, ((0, 0), (0, 0), (1, 1), (1, 1)))
        out = 0.0
        for t, (dy, dx) in enumerate(_TAPS):
            patch = xp[:, :, 1 + dy:1 + dy + H, 1 + dx:1 + dx + W]
            out = out + jnp.einsum("oc,bchw->bohw", wt[t], patch)
        return out + bias.reshape(1, -1, 1, 1)

    h1 = jnp.maximum(conv3x3(x, w1, b1), 0.0)
    act = conv3x3(h1, w2, b2)                               # hooked (pre-ReLU)
    pooled = jnp.mean(jnp.maximum(act, 0.0), axis=(2, 3))
    logits = pooled @ wfc + bfc
    return logits, act


# ---------------------------------------------------------------------------
# Demo
# ---------------------------------------------------------------------------

if __name__ == "__main__":
    key = jax.random.PRNGKey(0)
    kparam, kinput = jax.random.split(key)

    model = GradCamModel(kparam, cin=4, cmid=8, clast=8, num_classes=10)

    # Small NCHW input, matching the PyTorch module's convention.
    x = jax.random.normal(kinput, (2, 4, 16, 16), jnp.float32)

    fwd = jax.jit(lambda inp: model(inp))
    logits, selected_out = fwd(x)
    jax.block_until_ready(logits)
    jax.block_until_ready(selected_out)

    assert logits.shape == (2, 10)
    assert selected_out.shape == (2, 8, 16, 16)
    assert logits.dtype == jnp.float32 and selected_out.dtype == jnp.float32

    # Numerical self-check against the pure-JAX reference of the same module.
    ref_logits, ref_act = _reference_forward(
        x, model.w1, model.b1, model.w2, model.b2, model.wfc, model.bfc)
    assert jnp.allclose(selected_out, ref_act, rtol=2e-2, atol=2e-2)
    assert jnp.allclose(logits, ref_logits, rtol=2e-2, atol=2e-2)

    print("KERNEL_OK")
</pallas_src>

<mosaic_0001>
module attributes {stable_mosaic.version = 11 : i64} {
  func.func @_fused_forward_kernel(%arg0: i32, %arg1: memref<1x4x256xf32, #tpu.memory_space<vmem>>, %arg2: memref<8x36xf32, #tpu.memory_space<vmem>>, %arg3: memref<8x1xf32, #tpu.memory_space<vmem>>, %arg4: memref<8x72xf32, #tpu.memory_space<vmem>>, %arg5: memref<8x1xf32, #tpu.memory_space<vmem>>, %arg6: memref<8x128xf32, #tpu.memory_space<vmem>>, %arg7: memref<1x128xf32, #tpu.memory_space<vmem>>, %arg8: memref<1x8x256xf32, #tpu.memory_space<vmem>>, %arg9: memref<1x1x128xf32, #tpu.memory_space<vmem>>, %arg10: memref<4x512xf32, #tpu.memory_space<vmem>>, %arg11: memref<8x512xf32, #tpu.memory_space<vmem>>, %arg12: memref<36x256xf32, #tpu.memory_space<vmem>>, %arg13: memref<72x256xf32, #tpu.memory_space<vmem>>) attributes {dimension_semantics = [#tpu.dimension_semantics<parallel>], iteration_bounds = array<i64: 2>, scalar_prefetch = 0 : i64, scratch_operands = 4 : i64, tpu.core_type = #tpu.core_type<tc>, window_params = [{transform_indices = @transform_0, window_bounds = array<i64: 1, 4, 256>}, {pipeline_mode = #tpu.pipeline_mode<synchronous>, transform_indices = @transform_1, window_bounds = array<i64: 8, 36>}, {pipeline_mode = #tpu.pipeline_mode<synchronous>, transform_indices = @transform_2, window_bounds = array<i64: 8, 1>}, {pipeline_mode = #tpu.pipeline_mode<synchronous>, transform_indices = @transform_3, window_bounds = array<i64: 8, 72>}, {pipeline_mode = #tpu.pipeline_mode<synchronous>, transform_indices = @transform_4, window_bounds = array<i64: 8, 1>}, {pipeline_mode = #tpu.pipeline_mode<synchronous>, transform_indices = @transform_5, window_bounds = array<i64: 8, 128>}, {pipeline_mode = #tpu.pipeline_mode<synchronous>, transform_indices = @transform_6, window_bounds = array<i64: 1, 128>}, {transform_indices = @transform_7, window_bounds = array<i64: 1, 8, 256>}, {transform_indices = @transform_8, window_bounds = array<i64: 1, 1, 128>}]} {
    %0 = tpu.iota {dimensions = array<i32: 1>} : vector<1x256xi32>
    %c16_i32 = arith.constant 16 : i32
    %c0_i32 = arith.constant 0 : i32
    %1 = arith.cmpi eq, %c16_i32, %c0_i32 : i32
    %c1_i32 = arith.constant 1 : i32
    %2 = arith.select %1, %c1_i32, %c16_i32 : i32
    %3 = vector.broadcast %2 : i32 to vector<1x256xi32>
    %4 = arith.remsi %0, %3 : vector<1x256xi32>
    %c0_i32_0 = arith.constant 0 : i32
    %5 = vector.broadcast %c0_i32_0 : i32 to vector<1x256xi32>
    %6 = arith.cmpi ne, %4, %5 : vector<1x256xi32>
    %c0_i32_1 = arith.constant 0 : i32
    %7 = vector.broadcast %c0_i32_1 : i32 to vector<1x256xi32>
    %8 = arith.cmpi slt, %4, %7 : vector<1x256xi32>
    %c0_i32_2 = arith.constant 0 : i32
    %9 = arith.cmpi slt, %2, %c0_i32_2 : i32
    %10 = vector.broadcast %9 : i1 to vector<1x256xi1>
    %11 = vector.broadcast %10 : vector<1x256xi1> to vector<1x256xi1>
    %12 = arith.xori %8, %11 : vector<1x256xi1>
    %13 = arith.andi %12, %6 : vector<1x256xi1>
    %14 = vector.broadcast %2 : i32 to vector<1x256xi32>
    %15 = arith.addi %4, %14 : vector<1x256xi32>
    %16 = arith.select %13, %15, %4 : vector<1x256xi1>, vector<1x256xi32>
    %c0_i32_3 = arith.constant 0 : i32
    %17 = vector.broadcast %c0_i32_3 : i32 to vector<1x256xi32>
    %18 = arith.cmpi sgt, %16, %17 : vector<1x256xi32>
    %c15_i32 = arith.constant 15 : i32
    %19 = vector.broadcast %c15_i32 : i32 to vector<1x256xi32>
    %20 = arith.cmpi slt, %16, %19 : vector<1x256xi32>
    %cst = arith.constant 0.000000e+00 : f32
    %21 = vector.broadcast %cst : f32 to vector<4x128xf32>
    %c0 = arith.constant 0 : index
    %c0_4 = arith.constant 0 : index
    %22 = vector.load %arg10[%c0, %c0_4] : memref<4x512xf32, #tpu.memory_space<vmem>>, vector<4x128xf32>
    tpu.vector_store %arg10[%c0, %c0_4], %21 {strides = array<i32>} : memref<4x512xf32, #tpu.memory_space<vmem>>, vector<4x128xf32>,
    %cst_5 = arith.constant 0.000000e+00 : f32
    %23 = vector.broadcast %cst_5 : f32 to vector<4x128xf32>
    %c0_6 = arith.constant 0 : index
    %c384 = arith.constant 384 : index
    %24 = vector.load %arg10[%c0_6, %c384] : memref<4x512xf32, #tpu.memory_space<vmem>>, vector<4x128xf32>
    tpu.vector_store %arg10[%c0_6, %c384], %23 {strides = array<i32>} : memref<4x512xf32, #tpu.memory_space<vmem>>, vector<4x128xf32>,
    %cst_7 = arith.constant 0.000000e+00 : f32
    %25 = vector.broadcast %cst_7 : f32 to vector<8x128xf32>
    %c0_8 = arith.constant 0 : index
    %c0_9 = arith.constant 0 : index
    %26 = vector.load %arg11[%c0_8, %c0_9] : memref<8x512xf32, #tpu.memory_space<vmem>>, vector<8x128xf32>
    tpu.vector_store %arg11[%c0_8, %c0_9], %25 {strides = array<i32>} : memref<8x512xf32, #tpu.memory_space<vmem>>, vector<8x128xf32>,
    %cst_10 = arith.constant 0.000000e+00 : f32
    %27 = vector.broadcast %cst_10 : f32 to vector<8x128xf32>
    %c0_11 = arith.constant 0 : index
    %c384_12 = arith.constant 384 : index
    %28 = vector.load %arg11[%c0_11, %c384_12] : memref<8x512xf32, #tpu.memory_space<vmem>>, vector<8x128xf32>
    tpu.vector_store %arg11[%c0_11, %c384_12], %27 {strides = array<i32>} : memref<8x512xf32, #tpu.memory_space<vmem>>, vector<8x128xf32>,
    %c0_13 = arith.constant 0 : index
    %c0_14 = arith.constant 0 : index
    %c0_15 = arith.constant 0 : index
    %29 = vector.load %arg1[%c0_13, %c0_14, %c0_15] : memref<1x4x256xf32, #tpu.memory_space<vmem>>, vector<1x4x256xf32>
    %30 = vector.shape_cast %29 : vector<1x4x256xf32> to vector<4x256xf32>
    %c0_16 = arith.constant 0 : index
    %c128 = arith.constant 128 : index
    %31 = vector.load %arg10[%c0_16, %c128] : memref<4x512xf32, #tpu.memory_space<vmem>>, vector<4x256xf32>
    tpu.vector_store %arg10[%c0_16, %c128], %30 {strides = array<i32>} : memref<4x512xf32, #tpu.memory_space<vmem>>, vector<4x256xf32>,
    %32 = vector.shape_cast %18 : vector<1x256xi1> to vector<1x256xi1>
    %33 = vector.broadcast %32 : vector<1x256xi1> to vector<4x256xi1>
    %34 = vector.shape_cast %20 : vector<1x256xi1> to vector<1x256xi1>
    %35 = vector.broadcast %34 : vector<1x256xi1> to vector<4x256xi1>
    %c0_17 = arith.constant 0 : index
    %c111 = arith.constant 111 : index
    %36 = vector.load %arg10[%c0_17, %c111] : memref<4x512xf32, #tpu.memory_space<vmem>>, vector<4x256xf32>
    %cst_18 = arith.constant 0.000000e+00 : f32
    %37 = vector.broadcast %cst_18 : f32 to vector<4x256xf32>
    %38 = arith.select %33, %36, %37 : vector<4x256xi1>, vector<4x256xf32>
    %c0_19 = arith.constant 0 : index
    %c0_20 = arith.constant 0 : index
    %39 = vector.load %arg12[%c0_19, %c0_20] : memref<36x256xf32, #tpu.memory_space<vmem>>, vector<4x256xf32>
    tpu.vector_store %arg12[%c0_19, %c0_20], %38 {strides = array<i32>} : memref<36x256xf32, #tpu.memory_space<vmem>>, vector<4x256xf32>,
    %c0_21 = arith.constant 0 : index
    %c112 = arith.constant 112 : index
    %40 = vector.load %arg10[%c0_21, %c112] : memref<4x512xf32, #tpu.memory_space<vmem>>, vector<4x256xf32>
    %c4 = arith.constant 4 : index
    %c0_22 = arith.constant 0 : index
    %41 = vector.load %arg12[%c4, %c0_22] : memref<36x256xf32, #tpu.memory_space<vmem>>, vector<4x256xf32>
    tpu.vector_store %arg12[%c4, %c0_22], %40 {strides = array<i32>} : memref<36x256xf32, #tpu.memory_space<vmem>>, vector<4x256xf32>,
    %c0_23 = arith.constant 0 : index
    %c113 = arith.constant 113 : index
    %42 = vector.load %arg10[%c0_23, %c113] : memref<4x512xf32, #tpu.memory_space<vmem>>, vector<4x256xf32>
    %cst_24 = arith.constant 0.000000e+00 : f32
    %43 = vector.broadcast %cst_24 : f32 to vector<4x256xf32>
    %44 = arith.select %35, %42, %43 : vector<4x256xi1>, vector<4x256xf32>
    %c8 = arith.constant 8 : index
    %c0_25 = arith.constant 0 : index
    %45 = vector.load %arg12[%c8, %c0_25] : memref<36x256xf32, #tpu.memory_space<vmem>>, vector<4x256xf32>
    tpu.vector_store %arg12[%c8, %c0_25], %44 {strides = array<i32>} : memref<36x256xf32, #tpu.memory_space<vmem>>, vector<4x256xf32>,
    %c0_26 = arith.constant 0 : index
    %c127 = arith.constant 127 : index
    %46 = vector.load %arg10[%c0_26, %c127] : memref<4x512xf32, #tpu.memory_space<vmem>>, vector<4x256xf32>
    %cst_27 = arith.constant 0.000000e+00 : f32
    %47 = vector.broadcast %cst_27 : f32 to vector<4x256xf32>
    %48 = arith.select %33, %46, %47 : vector<4x256xi1>, vector<4x256xf32>
    %c12 = arith.constant 12 : index
    %c0_28 = arith.constant 0 : index
    %49 = vector.load %arg12[%c12, %c0_28] : memref<36x256xf32, #tpu.memory_space<vmem>>, vector<4x256xf32>
    tpu.vector_store %arg12[%c12, %c0_28], %48 {strides = array<i32>} : memref<36x256xf32, #tpu.memory_space<vmem>>, vector<4x256xf32>,
    %c0_29 = arith.constant 0 : index
    %c128_30 = arith.constant 128 : index
    %50 = vector.load %arg10[%c0_29, %c128_30] : memref<4x512xf32, #tpu.memory_space<vmem>>, vector<4x256xf32>
    %c16 = arith.constant 16 : index
    %c0_31 = arith.constant 0 : index
    %51 = vector.load %arg12[%c16, %c0_31] : memref<36x256xf32, #tpu.memory_space<vmem>>, vector<4x256xf32>
    tpu.vector_store %arg12[%c16, %c0_31], %50 {strides = array<i32>} : memref<36x256xf32, #tpu.memory_space<vmem>>, vector<4x256xf32>,
    %c0_32 = arith.constant 0 : index
    %c129 = arith.constant 129 : index
    %52 = vector.load %arg10[%c0_32, %c129] : memref<4x512xf32, #tpu.memory_space<vmem>>, vector<4x256xf32>
    %cst_33 = arith.constant 0.000000e+00 : f32
    %53 = vector.broadcast %cst_33 : f32 to vector<4x256xf32>
    %54 = arith.select %35, %52, %53 : vector<4x256xi1>, vector<4x256xf32>
    %c20 = arith.constant 20 : index
    %c0_34 = arith.constant 0 : index
    %55 = vector.load %arg12[%c20, %c0_34] : memref<36x256xf32, #tpu.memory_space<vmem>>, vector<4x256xf32>
    tpu.vector_store %arg12[%c20, %c0_34], %54 {strides = array<i32>} : memref<36x256xf32, #tpu.memory_space<vmem>>, vector<4x256xf32>,
    %c0_35 = arith.constant 0 : index
    %c143 = arith.constant 143 : index
    %56 = vector.load %arg10[%c0_35, %c143] : memref<4x512xf32, #tpu.memory_space<vmem>>, vector<4x256xf32>
    %cst_36 = arith.constant 0.000000e+00 : f32
    %57 = vector.broadcast %cst_36 : f32 to vector<4x256xf32>
    %58 = arith.select %33, %56, %57 : vector<4x256xi1>, vector<4x256xf32>
    %c24 = arith.constant 24 : index
    %c0_37 = arith.constant 0 : index
    %59 = vector.load %arg12[%c24, %c0_37] : memref<36x256xf32, #tpu.memory_space<vmem>>, vector<4x256xf32>
    tpu.vector_store %arg12[%c24, %c0_37], %58 {strides = array<i32>} : memref<36x256xf32, #tpu.memory_space<vmem>>, vector<4x256xf32>,
    %c0_38 = arith.constant 0 : index
    %c144 = arith.constant 144 : index
    %60 = vector.load %arg10[%c0_38, %c144] : memref<4x512xf32, #tpu.memory_space<vmem>>, vector<4x256xf32>
    %c28 = arith.constant 28 : index
    %c0_39 = arith.constant 0 : index
    %61 = vector.load %arg12[%c28, %c0_39] : memref<36x256xf32, #tpu.memory_space<vmem>>, vector<4x256xf32>
    tpu.vector_store %arg12[%c28, %c0_39], %60 {strides = array<i32>} : memref<36x256xf32, #tpu.memory_space<vmem>>, vector<4x256xf32>,
    %c0_40 = arith.constant 0 : index
    %c145 = arith.constant 145 : index
    %62 = vector.load %arg10[%c0_40, %c145] : memref<4x512xf32, #tpu.memory_space<vmem>>, vector<4x256xf32>
    %cst_41 = arith.constant 0.000000e+00 : f32
    %63 = vector.broadcast %cst_41 : f32 to vector<4x256xf32>
    %64 = arith.select %35, %62, %63 : vector<4x256xi1>, vector<4x256xf32>
    %c32 = arith.constant 32 : index
    %c0_42 = arith.constant 0 : index
    %65 = vector.load %arg12[%c32, %c0_42] : memref<36x256xf32, #tpu.memory_space<vmem>>, vector<4x256xf32>
    tpu.vector_store %arg12[%c32, %c0_42], %64 {strides = array<i32>} : memref<36x256xf32, #tpu.memory_space<vmem>>, vector<4x256xf32>,
    %c0_43 = arith.constant 0 : index
    %c0_44 = arith.constant 0 : index
    %66 = vector.load %arg2[%c0_43, %c0_44] : memref<8x36xf32, #tpu.memory_space<vmem>>, vector<8x36xf32>
    %c0_45 = arith.constant 0 : index
    %c0_46 = arith.constant 0 : index
    %67 = vector.load %arg12[%c0_45, %c0_46] : memref<36x256xf32, #tpu.memory_space<vmem>>, vector<36x256xf32>
    %cst_47 = arith.constant dense<0.000000e+00> : vector<8x256xf32>
    %68 = tpu.matmul %66, %67, %cst_47 {dimension_numbers = #tpu.dot_dimension_numbers<[1], [0], [0], [1], [0, 0, 1, 1], [], []>} : vector<8x36xf32>, vector<36x256xf32>, vector<8x256xf32> -> vector<8x256xf32>
    %c0_48 = arith.constant 0 : index
    %c0_49 = arith.constant 0 : index
    %69 = vector.load %arg3[%c0_48, %c0_49] : memref<8x1xf32, #tpu.memory_space<vmem>>, vector<8x1xf32>
    %70 = vector.broadcast %69 : vector<8x1xf32> to vector<8x256xf32>
    %71 = arith.addf %68, %70 : vector<8x256xf32>
    %cst_50 = arith.constant 0.000000e+00 : f32
    %72 = vector.broadcast %cst_50 : f32 to vector<8x256xf32>
    %73 = arith.maximumf %71, %72 : vector<8x256xf32>
    %c0_51 = arith.constant 0 : index
    %c128_52 = arith.constant 128 : index
    %74 = vector.load %arg11[%c0_51, %c128_52] : memref<8x512xf32, #tpu.memory_space<vmem>>, vector<8x256xf32>
    tpu.vector_store %arg11[%c0_51, %c128_52], %73 {strides = array<i32>} : memref<8x512xf32, #tpu.memory_space<vmem>>, vector<8x256xf32>,
    %75 = vector.shape_cast %18 : vector<1x256xi1> to vector<1x256xi1>
    %76 = vector.broadcast %75 : vector<1x256xi1> to vector<8x256xi1>
    %77 = vector.shape_cast %20 : vector<1x256xi1> to vector<1x256xi1>
    %78 = vector.broadcast %77 : vector<1x256xi1> to vector<8x256xi1>
    %c0_53 = arith.constant 0 : index
    %c111_54 = arith.constant 111 : index
    %79 = vector.load %arg11[%c0_53, %c111_54] : memref<8x512xf32, #tpu.memory_space<vmem>>, vector<8x256xf32>
    %cst_55 = arith.constant 0.000000e+00 : f32
    %80 = vector.broadcast %cst_55 : f32 to vector<8x256xf32>
    %81 = arith.select %76, %79, %80 : vector<8x256xi1>, vector<8x256xf32>
    %c0_56 = arith.constant 0 : index
    %c0_57 = arith.constant 0 : index
    %82 = vector.load %arg13[%c0_56, %c0_57] : memref<72x256xf32, #tpu.memory_space<vmem>>, vector<8x256xf32>
    tpu.vector_store %arg13[%c0_56, %c0_57], %81 {strides = array<i32>} : memref<72x256xf32, #tpu.memory_space<vmem>>, vector<8x256xf32>,
    %c0_58 = arith.constant 0 : index
    %c112_59 = arith.constant 112 : index
    %83 = vector.load %arg11[%c0_58, %c112_59] : memref<8x512xf32, #tpu.memory_space<vmem>>, vector<8x256xf32>
    %c8_60 = arith.constant 8 : index
    %c0_61 = arith.constant 0 : index
    %84 = vector.load %arg13[%c8_60, %c0_61] : memref<72x256xf32, #tpu.memory_space<vmem>>, vector<8x256xf32>
    tpu.vector_store %arg13[%c8_60, %c0_61], %83 {strides = array<i32>} : memref<72x256xf32, #tpu.memory_space<vmem>>, vector<8x256xf32>,
    %c0_62 = arith.constant 0 : index
    %c113_63 = arith.constant 113 : index
    %85 = vector.load %arg11[%c0_62, %c113_63] : memref<8x512xf32, #tpu.memory_space<vmem>>, vector<8x256xf32>
    %cst_64 = arith.constant 0.000000e+00 : f32
    %86 = vector.broadcast %cst_64 : f32 to vector<8x256xf32>
    %87 = arith.select %78, %85, %86 : vector<8x256xi1>, vector<8x256xf32>
    %c16_65 = arith.constant 16 : index
    %c0_66 = arith.constant 0 : index
    %88 = vector.load %arg13[%c16_65, %c0_66] : memref<72x256xf32, #tpu.memory_space<vmem>>, vector<8x256xf32>
    tpu.vector_store %arg13[%c16_65, %c0_66], %87 {strides = array<i32>} : memref<72x256xf32, #tpu.memory_space<vmem>>, vector<8x256xf32>,
    %c0_67 = arith.constant 0 : index
    %c127_68 = arith.constant 127 : index
    %89 = vector.load %arg11[%c0_67, %c127_68] : memref<8x512xf32, #tpu.memory_space<vmem>>, vector<8x256xf32>
    %cst_69 = arith.constant 0.000000e+00 : f32
    %90 = vector.broadcast %cst_69 : f32 to vector<8x256xf32>
    %91 = arith.select %76, %89, %90 : vector<8x256xi1>, vector<8x256xf32>
    %c24_70 = arith.constant 24 : index
    %c0_71 = arith.constant 0 : index
    %92 = vector.load %arg13[%c24_70, %c0_71] : memref<72x256xf32, #tpu.memory_space<vmem>>, vector<8x256xf32>
    tpu.vector_store %arg13[%c24_70, %c0_71], %91 {strides = array<i32>} : memref<72x256xf32, #tpu.memory_space<vmem>>, vector<8x256xf32>,
    %c0_72 = arith.constant 0 : index
    %c128_73 = arith.constant 128 : index
    %93 = vector.load %arg11[%c0_72, %c128_73] : memref<8x512xf32, #tpu.memory_space<vmem>>, vector<8x256xf32>
    %c32_74 = arith.constant 32 : index
    %c0_75 = arith.constant 0 : index
    %94 = vector.load %arg13[%c32_74, %c0_75] : memref<72x256xf32, #tpu.memory_space<vmem>>, vector<8x256xf32>
    tpu.vector_store %arg13[%c32_74, %c0_75], %93 {strides = array<i32>} : memref<72x256xf32, #tpu.memory_space<vmem>>, vector<8x256xf32>,
    %c0_76 = arith.constant 0 : index
    %c129_77 = arith.constant 129 : index
    %95 = vector.load %arg11[%c0_76, %c129_77] : memref<8x512xf32, #tpu.memory_space<vmem>>, vector<8x256xf32>
    %cst_78 = arith.constant 0.000000e+00 : f32
    %96 = vector.broadcast %cst_78 : f32 to vector<8x256xf32>
    %97 = arith.select %78, %95, %96 : vector<8x256xi1>, vector<8x256xf32>
    %c40 = arith.constant 40 : index
    %c0_79 = arith.constant 0 : index
    %98 = vector.load %arg13[%c40, %c0_79] : memref<72x256xf32, #tpu.memory_space<vmem>>, vector<8x256xf32>
    tpu.vector_store %arg13[%c40, %c0_79], %97 {strides = array<i32>} : memref<72x256xf32, #tpu.memory_space<vmem>>, vector<8x256xf32>,
    %c0_80 = arith.constant 0 : index
    %c143_81 = arith.constant 143 : index
    %99 = vector.load %arg11[%c0_80, %c143_81] : memref<8x512xf32, #tpu.memory_space<vmem>>, vector<8x256xf32>
    %cst_82 = arith.constant 0.000000e+00 : f32
    %100 = vector.broadcast %cst_82 : f32 to vector<8x256xf32>
    %101 = arith.select %76, %99, %100 : vector<8x256xi1>, vector<8x256xf32>
    %c48 = arith.constant 48 : index
    %c0_83 = arith.constant 0 : index
    %102 = vector.load %arg13[%c48, %c0_83] : memref<72x256xf32, #tpu.memory_space<vmem>>, vector<8x256xf32>
    tpu.vector_store %arg13[%c48, %c0_83], %101 {strides = array<i32>} : memref<72x256xf32, #tpu.memory_space<vmem>>, vector<8x256xf32>,
    %c0_84 = arith.constant 0 : index
    %c144_85 = arith.constant 144 : index
    %103 = vector.load %arg11[%c0_84, %c144_85] : memref<8x512xf32, #tpu.memory_space<vmem>>, vector<8x256xf32>
    %c56 = arith.constant 56 : index
    %c0_86 = arith.constant 0 : index
    %104 = vector.load %arg13[%c56, %c0_86] : memref<72x256xf32, #tpu.memory_space<vmem>>, vector<8x256xf32>
    tpu.vector_store %arg13[%c56, %c0_86], %103 {strides = array<i32>} : memref<72x256xf32, #tpu.memory_space<vmem>>, vector<8x256xf32>,
    %c0_87 = arith.constant 0 : index
    %c145_88 = arith.constant 145 : index
    %105 = vector.load %arg11[%c0_87, %c145_88] : memref<8x512xf32, #tpu.memory_space<vmem>>, vector<8x256xf32>
    %cst_89 = arith.constant 0.000000e+00 : f32
    %106 = vector.broadcast %cst_89 : f32 to vector<8x256xf32>
    %107 = arith.select %78, %105, %106 : vector<8x256xi1>, vector<8x256xf32>
    %c64 = arith.constant 64 : index
    %c0_90 = arith.constant 0 : index
    %108 = vector.load %arg13[%c64, %c0_90] : memref<72x256xf32, #tpu.memory_space<vmem>>, vector<8x256xf32>
    tpu.vector_store %arg13[%c64, %c0_90], %107 {strides = array<i32>} : memref<72x256xf32, #tpu.memory_space<vmem>>, vector<8x256xf32>,
    %c0_91 = arith.constant 0 : index
    %c0_92 = arith.constant 0 : index
    %109 = vector.load %arg4[%c0_91, %c0_92] : memref<8x72xf32, #tpu.memory_space<vmem>>, vector<8x72xf32>
    %c0_93 = arith.constant 0 : index
    %c0_94 = arith.constant 0 : index
    %110 = vector.load %arg13[%c0_93, %c0_94] : memref<72x256xf32, #tpu.memory_space<vmem>>, vector<72x256xf32>
    %cst_95 = arith.constant dense<0.000000e+00> : vector<8x256xf32>
    %111 = tpu.matmul %109, %110, %cst_95 {dimension_numbers = #tpu.dot_dimension_numbers<[1], [0], [0], [1], [0, 0, 1, 1], [], []>} : vector<8x72xf32>, vector<72x256xf32>, vector<8x256xf32> -> vector<8x256xf32>
    %c0_96 = arith.constant 0 : index
    %c0_97 = arith.constant 0 : index
    %112 = vector.load %arg5[%c0_96, %c0_97] : memref<8x1xf32, #tpu.memory_space<vmem>>, vector<8x1xf32>
    %113 = vector.broadcast %112 : vector<8x1xf32> to vector<8x256xf32>
    %114 = arith.addf %111, %113 : vector<8x256xf32>
    %c0_98 = arith.constant 0 : index
    %c0_99 = arith.constant 0 : index
    %c0_100 = arith.constant 0 : index
    %115 = vector.load %arg8[%c0_98, %c0_99, %c0_100] : memref<1x8x256xf32, #tpu.memory_space<vmem>>, vector<1x8x256xf32>
    %116 = vector.shape_cast %115 : vector<1x8x256xf32> to vector<8x256xf32>
    %117 = vector.shape_cast %114 : vector<8x256xf32> to vector<1x8x256xf32>
    tpu.vector_store %arg8[%c0_98, %c0_99, %c0_100], %117 {strides = array<i32>} : memref<1x8x256xf32, #tpu.memory_space<vmem>>, vector<1x8x256xf32>,
    %cst_101 = arith.constant 0.000000e+00 : f32
    %118 = vector.broadcast %cst_101 : f32 to vector<8x256xf32>
    %119 = arith.maximumf %114, %118 : vector<8x256xf32>
    %cst_102 = arith.constant dense<0.000000e+00> : vector<8xf32>
    %120 = vector.multi_reduction <add>, %119, %cst_102 [1] : vector<8x256xf32> to vector<8xf32>
    %121 = vector.shape_cast %120 : vector<8xf32> to vector<8x1xf32>
    %cst_103 = arith.constant 3.906250e-03 : f32
    %122 = vector.broadcast %cst_103 : f32 to vector<8x1xf32>
    %123 = arith.mulf %121, %122 : vector<8x1xf32>
    %c0_104 = arith.constant 0 : index
    %c0_105 = arith.constant 0 : index
    %124 = vector.load %arg6[%c0_104, %c0_105] : memref<8x128xf32, #tpu.memory_space<vmem>>, vector<8x128xf32>
    %125 = vector.broadcast %123 : vector<8x1xf32> to vector<8x128xf32>
    %126 = arith.mulf %125, %124 : vector<8x128xf32>
    %cst_106 = arith.constant dense<0.000000e+00> : vector<128xf32>
    %127 = vector.multi_reduction <add>, %126, %cst_106 [0] : vector<8x128xf32> to vector<128xf32>
    %128 = vector.shape_cast %127 : vector<128xf32> to vector<1x128xf32>
    %c0_107 = arith.constant 0 : index
    %c0_108 = arith.constant 0 : index
    %129 = vector.load %arg7[%c0_107, %c0_108] : memref<1x128xf32, #tpu.memory_space<vmem>>, vector<1x128xf32>
    %130 = arith.addf %128, %129 : vector<1x128xf32>
    %c0_109 = arith.constant 0 : index
    %c0_110 = arith.constant 0 : index
    %c0_111 = arith.constant 0 : index
    %131 = vector.load %arg9[%c0_109, %c0_110, %c0_111] : memref<1x1x128xf32, #tpu.memory_space<vmem>>, vector<1x1x128xf32>
    %132 = vector.shape_cast %131 : vector<1x1x128xf32> to vector<1x128xf32>
    %133 = vector.shape_cast %130 : vector<1x128xf32> to vector<1x1x128xf32>
    tpu.vector_store %arg9[%c0_109, %c0_110, %c0_111], %133 {strides = array<i32>} : memref<1x1x128xf32, #tpu.memory_space<vmem>>, vector<1x1x128xf32>,
    return
  }
  func.func @transform_0(%arg0: i32) -> (i32, i32, i32) {
    %c0_i32 = arith.constant 0 : i32
    %c0_i32_0 = arith.constant 0 : i32
    %c0_i32_1 = arith.constant 0 : i32
    return %arg0, %c0_i32, %c0_i32_0 : i32, i32, i32
  }
  func.func @transform_1(%arg0: i32) -> (i32, i32) {
    %c0_i32 = arith.constant 0 : i32
    %c0_i32_0 = arith.constant 0 : i32
    %c0_i32_1 = arith.constant 0 : i32
    return %c0_i32, %c0_i32_0 : i32, i32
  }
  func.func @transform_2(%arg0: i32) -> (i32, i32) {
    %c0_i32 = arith.constant 0 : i32
    %c0_i32_0 = arith.constant 0 : i32
    %c0_i32_1 = arith.constant 0 : i32
    return %c0_i32, %c0_i32_0 : i32, i32
  }
  func.func @transform_3(%arg0: i32) -> (i32, i32) {
    %c0_i32 = arith.constant 0 : i32
    %c0_i32_0 = arith.constant 0 : i32
    %c0_i32_1 = arith.constant 0 : i32
    return %c0_i32, %c0_i32_0 : i32, i32
  }
  func.func @transform_4(%arg0: i32) -> (i32, i32) {
    %c0_i32 = arith.constant 0 : i32
    %c0_i32_0 = arith.constant 0 : i32
    %c0_i32_1 = arith.constant 0 : i32
    return %c0_i32, %c0_i32_0 : i32, i32
  }
  func.func @transform_5(%arg0: i32) -> (i32, i32) {
    %c0_i32 = arith.constant 0 : i32
    %c0_i32_0 = arith.constant 0 : i32
    %c0_i32_1 = arith.constant 0 : i32
    return %c0_i32, %c0_i32_0 : i32, i32
  }
  func.func @transform_6(%arg0: i32) -> (i32, i32) {
    %c0_i32 = arith.constant 0 : i32
    %c0_i32_0 = arith.constant 0 : i32
    %c0_i32_1 = arith.constant 0 : i32
    return %c0_i32, %c0_i32_0 : i32, i32
  }
  func.func @transform_7(%arg0: i32) -> (i32, i32, i32) {
    %c0_i32 = arith.constant 0 : i32
    %c0_i32_0 = arith.constant 0 : i32
    %c0_i32_1 = arith.constant 0 : i32
    return %arg0, %c0_i32, %c0_i32_0 : i32, i32, i32
  }
  func.func @transform_8(%arg0: i32) -> (i32, i32, i32) {
    %c0_i32 = arith.constant 0 : i32
    %c0_i32_0 = arith.constant 0 : i32
    %c0_i32_1 = arith.constant 0 : i32
    return %arg0, %c0_i32, %c0_i32_0 : i32, i32, i32
  }
}

</mosaic_0001>

<bundles_post_ra>
// kernel: _lambda_.1
= control target key start
LH: loop header
LB: loop body
LE: loop exit
PB: predicated region body
PF: predicated region fallthrough
CT: control target
= control target key end

     0   :  { %14 = vsyncpa [#allocation7], 0  ;;  %s1597_s0 = inlined_call_operand.vmem [shape: f32[2,4,256], index: 0, kind: input, shape index: {}]   ;;  %s1598_s1 = inlined_call_operand.vmem [shape: f32[8,36], index: 1, kind: input, shape index: {}]   ;;  %s1599_s2 = inlined_call_operand.vmem [shape: f32[8,1], index: 2, kind: input, shape index: {}]   ;;  %s1600_s3 = inlined_call_operand.vmem [shape: f32[8,72], index: 3, kind: input, shape index: {}]   ;;  %s1601_s4 = inlined_call_operand.vmem [shape: f32[8,1], index: 4, kind: input, shape index: {}]   ;;  %s1602_s5 = inlined_call_operand.vmem [shape: f32[8,128], index: 5, kind: input, shape index: {}]   ;;  %s1603_s6 = inlined_call_operand.vmem [shape: f32[1,128], index: 6, kind: input, shape index: {}]   ;;  %s1604_s7 = inlined_call_operand.vmem [shape: f32[2,8,256], index: 7, kind: output, shape index: {0}]   ;;  %s1605_s8 = inlined_call_operand.hbm [shape: f32[2,1,128], index: 8, kind: output, shape index: {1}]  }
   0x1   :  { %16 = vsyncpa [#allocation7 + $0x1], 0  ;;  %s1295_s27 = smov 0   ;;  %s1297_s28 = smov 0  }
   0x2   :  { %s1299_s29 = smov 0   ;;  %s1301_s30 = smov 0  }
   0x3 LB: > { %s1316_s9 = sadd.s32 4294967295, %s1236_s30   ;;  %s1020_s10 = sadd.s32 4294967294, %s1236_s30   ;;  %s1236_s30 = sphi %s1301_s30, %s1623_s30   ;;  %s1232_s29 = sphi %s1299_s29, %s1622_s29   ;;  %s1228_s28 = sphi %s1297_s28, %s1621_s28   ;;  %s1224_s27 = sphi %s1295_s27, %s1620_s27  }
   0x4   : > { %s1320_s11 = sadd.s32 1, %s1236_s30   ;;  %s207_s12 = sadd.s32 1, %s1232_s29 }
   0x5   : > { %s204_s13 = ssub.s32 %s1236_s30, %s1320_s11  ;;  %p217_p0 = scmp.ne.s32.totalorder %s1232_s29, %s1228_s28 }
   0x6   : > { %p205_p1 = scmp.eq.s32.totalorder %s204_s13, 0  ;;  %p218_p2 = scmp.eq.s32.totalorder %s1316_s9, 1 }
   0x7   : > { %p223_p3 = scmp.ne.s32.totalorder %s1228_s28, %s1224_s27  ;;  %p224_p4 = scmp.eq.s32.totalorder %s1020_s10, 1 }
   0x8   : > { %s1331_s14 = scalar_select %p205_p1, %s1232_s29, %s207_s12  }
   0x9   : > { %p1333_p5 = por %p218_p2, %p217_p0  ;;  %p1337_p6 = por %p224_p4, %p223_p3 }
   0xa   : > { %p1023_p7 = scmp.ge.s32.totalorder %s1236_s30, 1  ;;  %p268_p8 = scmp.lt.s32.totalorder %s1236_s30, 3 }
   0xc   : > { %p269_p9 = pnand %p1023_p7, %p268_p8 }
   0xd   : > { %p306_p10 = scmp.lt.s32.totalorder (!%p269_p9), %s1316_s9, 1  ;;  %v1238_v0 = vmov (!%p269_p9), 0.0   ;;  %s1239_s22 = smov (!%p269_p9), 1   ;;  %v1247_v15 = vmov (!%p269_p9), 0   ;;  %v548_v16 = vld [vmem:[%s1599_s2] sm:$0xff] (!%p269_p9)  ;;  %v316_v17 = vlaneseq (!%p269_p9)  ;;  %vm372_vm0 = vcmask (!%p269_p9), 138240  }
   0xe   : > { %272 = sbr.rel (%p269_p9) target bundleno = 960 (0x3c0), region = 48  ;;  %347 = vst [vmem:[#allocation2] sm:$0xf] (!%p269_p9), %v1238_v0  ;;  %348 = vst [vmem:[#allocation2 + $0xc] sm:$0xf] (!%p269_p9), %v1238_v0  ;;  %629 = vmatprep.mubr.f32.mxu0 (!%p269_p9), %v1238_v0  ;;  %893 = vmatprep.mubr.f32.mxu1 (!%p269_p9), %v1238_v0  ;;  %s1240_s23 = smov (!%p269_p9), 17  }
   0xf   : > { %s1241_s24 = smov (!%p269_p9), 15   ;;  %s1242_s25 = smov (!%p269_p9), 16   ;;  %1131 = vset.pattern.permute.xlu0 (!%p269_p9), %v1247_v15  ;;  %1167 = vset.pattern.permute.xlu1 (!%p269_p9), %v1247_v15  ;;  %v317_v18 = vand.u32 (!%p269_p9), 127, %v316_v17  ;;  %vm411_vm3 = vcmask (!%p269_p9), 121856   ;;  %vm431_vm5 = vcmask (!%p269_p9), 7168   ;;  %vm393_vm6 = vcmask (!%p269_p9), 130048  }
  0x10   : > { %s1243_s26 = smov (!%p269_p9), 127   ;;  %s1244_s10 = smov (!%p269_p9), 113   ;;  %vm463_vm8 = vcmask (!%p269_p9), 1039360   ;;  %vm489_vm9 = vcmask (!%p269_p9), 924672   ;;  %vm510_vm10 = vcmask (!%p269_p9), 916480   ;;  %vm528_vm11 = vcmask (!%p269_p9), 908288  }
  0x11   : > { %s1245_s12 = smov (!%p269_p9), 112   ;;  %s1246_s13 = smov (!%p269_p9), 111   ;;  %v318_v19 = vadd.s32 (!%p269_p9), 128, %v317_v18  ;;  %v323_v22 = vand.u32 (!%p269_p9), 15, %v317_v18  ;;  %vm558_vm12 = vcmask (!%p269_p9), 1043456   ;;  %vm554_vm13 = vcmask (!%p269_p9), 293888  }
  0x12   : > { %vm1248_vm14 = vmmov (!%p269_p9), 1   ;;  %v908_v48 = vld [vmem:[%s1602_s5] sm:$0xff] (!%p269_p9) }
  0x13   : > { %v330_v23 = vand.u32 (!%p269_p9), 15, %v318_v19  ;;  %vm1390_vm1 = vcmp.gt.s32.totalorder (!%p269_p9), %v323_v22, 0  ;;  %vm1418_vm7 = vcmp.lt.s32.totalorder (!%p269_p9), %v323_v22, 15 }
  0x15   : > { %s1349_s17 = scalar_select %p306_p10, %s1316_s9, 1  ;;  %v453_v10 = vld [vmem:[#allocation2 + $0xc] sm:$0xf]  ;;  %vm1394_vm2 = vcmp.gt.s32.totalorder %v330_v23, 0  ;;  %vm1404_vm4 = vcmp.lt.s32.totalorder %v330_v23, 15 }
  0x16   : > { %v479_v11 = vld [vmem:[#allocation2 + $0xc] sm:$0xf]  ;;  %vm1484_vm15 = vmpackc.low %vm1248_vm14, %vm1394_vm2 }
  0x17   : > { %s1035_s18 = sshll.u32 %s1349_s17, 3  ;;  %v1173_v12 = vld [vmem:[#allocation2 + $0xc] ss:$0 sps:$4 sm:$0xff]  }
  0x18   : > { %s310_s21 = scalar_lea.vmem %s1597_s0, %s1035_s18  ;;  %v518_v14 = vld [vmem:[#allocation2 + $0xc] sm:$0xf] }
  0x19   : > { %v351_v1 = vld [vmem:[%s310_s21] sm:$0xff] }
  0x1a   : > { %352 = vst [vmem:[#allocation2 + $0x4] sm:$0xff] %v351_v1  ;;  %v456_v2 = vcombine.high %v351_v1, %v351_v1  ;;  %450 = vst [vmem:[#allocation4 + $0x20] sm:$0xf] %v351_v1  ;;  %v502_v13 = vcombine.low %v351_v1, %v351_v1 }
  0x1c   : > { %451 = vst [vmem:[#allocation4 + $0x28] sm:$0xf] %v456_v2 }
  0x21   : > { %v421_v3 = vld [vmem:[#allocation2 + $0x8] sm:$0xf]  ;;  %v420_v4 = vld [vmem:[#allocation2] sm:$0xff] }
  0x22   : > { %429 = vrot.lane.b32.xlu0 %v421_v3, %s1239_s22  ;;  %425 = vrot.lane.b32.xlu1 %v420_v4, %s1239_s22  ;;  %v362_v5 = vld [vmem:[#allocation2 + $0x8] sm:$0xf]  ;;  %v424_v6 = vcombine.high %v420_v4, %v420_v4  ;;  %v385_v9 = vcombine.low %v420_v4, %v420_v4 }
  0x23   : > { %v401_v7 = vld [vmem:[#allocation2 + $0x8] sm:$0xf] }
  0x24   : > { %v1170_v8 = vld [vmem:[#allocation2 + $0x8] ss:$0 sps:$4 sm:$0xff]  }
  0x26   : > { %370 = vrot.lane.b32.xlu0 %v362_v5, %s1240_s23  ;;  %366 = vrot.lane.b32.xlu1 %v420_v4, %s1240_s23 }
  0x2a   : > { %409 = vrot.lane.b32.xlu0 %v401_v7, %s1241_s24  ;;  %368 = vrot.lane.b32.xlu1 %v424_v6, %s1240_s23 }
  0x2e   : > { %389 = vrot.lane.b32.xlu0 %v420_v4, %s1242_s25  ;;  %407 = vrot.lane.b32.xlu1 %v424_v6, %s1241_s24 }
  0x32   : > { %427 = vrot.lane.b32.xlu0 %v424_v6, %s1239_s22  ;;  %391 = vrot.lane.b32.xlu1 %v1170_v8, %s1242_s25 }
  0x36   : > { %405 = vrot.lane.b32.xlu0 %v420_v4, %s1241_s24  ;;  %387 = vrot.lane.b32.xlu1 %v385_v9, %s1242_s25 }
  0x3a   : > { %459 = vrot.lane.b32.xlu0 %v456_v2, %s1243_s26  ;;  %461 = vrot.lane.b32.xlu1 %v453_v10, %s1243_s26 }
  0x3e   : > { %457 = vrot.lane.b32.xlu0 %v351_v1, %s1243_s26  ;;  %485 = vrot.lane.b32.xlu1 %v456_v2, %s1244_s10 }
  0x42   : > { %487 = vrot.lane.b32.xlu0 %v479_v11, %s1244_s10  ;;  %483 = vrot.lane.b32.xlu1 %v351_v1, %s1244_s10 }
  0x46   : > { %506 = vrot.lane.b32.xlu0 %v351_v1, %s1245_s12  ;;  %508 = vrot.lane.b32.xlu1 %v1173_v12, %s1245_s12 }
  0x4a   : > { %504 = vrot.lane.b32.xlu0 %v502_v13, %s1245_s12  ;;  %524 = vrot.lane.b32.xlu1 %v456_v2, %s1246_s13 }
  0x4e   : > { %526 = vrot.lane.b32.xlu0 %v518_v14, %s1246_s13  ;;  %522 = vrot.lane.b32.xlu1 %v351_v1, %s1246_s13 }
  0x52   : > { %551 = vperm.xlu0 %1131, %v548_v16   ;;  %666 = vrot.lane.b32.xlu1 %v1238_v0, %s1242_s25 }
  0x56   : > { %646 = vrot.lane.b32.xlu0 %v1238_v0, %s1240_s23  ;;  %704 = vrot.lane.b32.xlu1 %v1238_v0, %s1239_s22 }
  0x5a   : > { %684 = vrot.lane.b32.xlu0 %v1238_v0, %s1241_s24 }
  0x94   : > { %v430_v20 = vpop.permute.xlu0 %429  ;;  %v426_v21 = vpop.permute.xlu1 %425 }
  0x98   : > { %v371_v24 = vpop.permute.xlu0 %370  ;;  %v367_v25 = vpop.permute.xlu1 %366 }
  0x9c   : > { %v410_v28 = vpop.permute.xlu0 %409  ;;  %v369_v29 = vpop.permute.xlu1 %368 }
  0x9d   : > { %v373_v30 = vsel %vm372_vm0, %v367_v25, %v369_v29  ;;  %v374_v31 = vsel %vm372_vm0, %v369_v29, %v371_v24 }
  0x9e   : > { %v377_v32 = vsel %vm1390_vm1, %v373_v30, 0.0  ;;  %v378_v33 = vsel %vm1394_vm2, %v374_v31, 0.0 }
  0x9f   : > { %379 = vst [vmem:[#allocation4] sm:$0xf] %v377_v32  ;;  %380 = vst [vmem:[#allocation4 + $0x8] sm:$0xf] %v378_v33 }
  0xa0   : > { %v390_v35 = vpop.permute.xlu0 %389  ;;  %v408_v36 = vpop.permute.xlu1 %407 }
  0xa1   : > { %v413_v37 = vsel %vm411_vm3, %v408_v36, %v410_v28 }
  0xa2   : > { %v417_v38 = vsel %vm1404_vm4, %v413_v37, 0.0 }
  0xa3   : > { %419 = vst [vmem:[#allocation4 + $0x18] sm:$0xf] %v417_v38 }
  0xa4   : > { %v428_v39 = vpop.permute.xlu0 %427  ;;  %v392_v40 = vpop.permute.xlu1 %391 }
  0xa5   : > { %v432_v41 = vsel %vm431_vm5, %v426_v21, %v428_v39  ;;  %v433_v42 = vsel %vm431_vm5, %v428_v39, %v430_v20  ;;  %v395_v43 = vsel %vm393_vm6, %v390_v35, %v392_v40 }
  0xa6   : > { %v436_v44 = vsel %vm1390_vm1, %v432_v41, 0.0  ;;  %v437_v45 = vsel %vm1394_vm2, %v433_v42, 0.0  ;;  %399 = vst [vmem:[#allocation4 + $0x8] sm:$0xf0] %v395_v43 }
  0xa7   : > { %v440_v46 = vrot.slane %v436_v44, 4  ;;  %v441_v47 = vrot.slane %v437_v45, 4 }
  0xa8   : > { %v406_v49 = vpop.permute.xlu0 %405  ;;  %v388_v50 = vpop.permute.xlu1 %387 }
  0xa9   : > { %444 = vst [vmem:[#allocation4 + $0x10] sm:$0xf0] %v440_v46  ;;  %445 = vst [vmem:[#allocation4 + $0x18] sm:$0xf0] %v441_v47  ;;  %v412_v51 = vsel %vm411_vm3, %v406_v49, %v408_v36  ;;  %v394_v52 = vsel %vm393_vm6, %v388_v50, %v390_v35  ;;  %v537_v36 = vld [vmem:[%s1598_s1] sm:$0xff] }
  0xaa   : > { %v416_v53 = vsel %vm1418_vm7, %v412_v51, 0.0  ;;  %398 = vst [vmem:[#allocation4] sm:$0xf0] %v394_v52  ;;  %v819_v46 = vld [vmem:[%s1601_s4] sm:$0xff] }
  0xab   : > { %418 = vst [vmem:[#allocation4 + $0x10] sm:$0xf] %v416_v53 }
  0xac   : > { %v460_v54 = vpop.permute.xlu0 %459  ;;  %v462_v55 = vpop.permute.xlu1 %461 }
  0xad   : > { %v465_v56 = vsel %vm463_vm8, %v460_v54, %v462_v55  ;;  %v539_v61 = vld [vmem:[#allocation4 + $0x8] sm:$0xff] }
  0xae   : > { %v469_v57 = vsel %vm1404_vm4, %v465_v56, 0.0 }
  0xaf   : > { %v473_v58 = vrot.slane %v469_v57, 4 }
  0xb0   : > { %v458_v59 = vpop.permute.xlu0 %457  ;;  %v486_v60 = vpop.permute.xlu1 %485  ;;  %v541_v62 = vld [vmem:[#allocation4 + $0x18] sm:$0xff] }
  0xb1   : > { %477 = vst [vmem:[#allocation4 + $0x28] sm:$0xf0] %v473_v58  ;;  %v464_v63 = vsel %vm463_vm8, %v458_v59, %v460_v54  ;;  %v1049_v1 = vpack.c.bf16 %v541_v62, %v539_v61  ;;  %v538_v2 = vld [vmem:[#allocation4] sm:$0xff] }
  0xb2   : > { %v468_v3 = vsel %vm1418_vm7, %v464_v63, 0.0  ;;  %v540_v4 = vld [vmem:[#allocation4 + $0x10] sm:$0xff] }
  0xb3   : > { %v472_v5 = vrot.slane %v468_v3, 4  ;;  %1050 = vmatprep.subr.bf16.mxu0 %v1049_v1  ;;  %v1051_v6 = vpack.c.bf16 %v540_v4, %v538_v2 }
  0xb4   : > { %v488_v7 = vpop.permute.xlu0 %487  ;;  %v484_v8 = vpop.permute.xlu1 %483 }
  0xb5   : > { %476 = vst [vmem:[#allocation4 + $0x20] sm:$0xf0] %v472_v5  ;;  %v491_v9 = vsel %vm489_vm9, %v486_v60, %v488_v7  ;;  %v490_v10 = vsel %vm489_vm9, %v484_v8, %v486_v60  ;;  %1052 = vmatpush1.bf16.msra.mxu0 %v1051_v6 }
  0xb6   : > { %v495_v11 = vsel %vm1394_vm2, %v491_v9, 0.0  ;;  %v494_v12 = vsel %vm1390_vm1, %v490_v10, 0.0 }
  0xb7   : > { %497 = vst [vmem:[#allocation4 + $0x38] sm:$0xf] %v495_v11  ;;  %496 = vst [vmem:[#allocation4 + $0x30] sm:$0xf] %v494_v12 }
  0xb8   : > { %v507_v13 = vpop.permute.xlu0 %506  ;;  %v509_v14 = vpop.permute.xlu1 %508  ;;  %v543_v23 = vld [vmem:[#allocation4 + $0x28] sm:$0xff] }
  0xb9   : > { %v512_v15 = vsel %vm510_vm10, %v507_v13, %v509_v14 }
  0xba   : > { %516 = vst [vmem:[#allocation4 + $0x38] sm:$0xf0] %v512_v15 }
  0xbc   : > { %v505_v16 = vpop.permute.xlu0 %504  ;;  %v525_v17 = vpop.permute.xlu1 %524  ;;  %v542_v30 = vld [vmem:[#allocation4 + $0x20] sm:$0xff] }
  0xbd   : > { %v511_v18 = vsel %vm510_vm10, %v505_v16, %v507_v13 }
  0xbe   : > { %515 = vst [vmem:[#allocation4 + $0x30] sm:$0xf0] %v511_v18 }
  0xc0   : > { %v527_v19 = vpop.permute.xlu0 %526  ;;  %v523_v20 = vpop.permute.xlu1 %522 }
  0xc1   : > { %v530_v21 = vsel %vm528_vm11, %v525_v17, %v527_v19  ;;  %v529_v22 = vsel %vm528_vm11, %v523_v20, %v525_v17  ;;  %v545_v24 = vld [vmem:[#allocation4 + $0x38] sm:$0xff] }
  0xc2   : > { %v534_v25 = vsel %vm1404_vm4, %v530_v21, 0.0  ;;  %v533_v28 = vsel %vm1418_vm7, %v529_v22, 0.0  ;;  %v1053_v29 = vpack.c.bf16 %v545_v24, %v543_v23 }
  0xc3   : > { %536 = vst [vmem:[#allocation4 + $0x48] sm:$0xf] %v534_v25  ;;  %535 = vst [vmem:[#allocation4 + $0x40] sm:$0xf] %v533_v28 }
  0xc4   : > { %1054 = vmatprep.subr.bf16.mxu0 %v1053_v29  ;;  %v667_v49 = vpop.permute.xlu1 %666 }
  0xc5   : > { %v544_v31 = vld [vmem:[#allocation4 + $0x30] sm:$0xff] }
  0xc6   : > { %v1055_v32 = vpack.c.bf16 %v544_v31, %v542_v30 }
  0xc8   : > { %1056 = vmatpush1.bf16.msra.mxu0 %v1055_v32  ;;  %v705_v51 = vpop.permute.xlu1 %704 }
  0xca   : > { %v547_v33 = vld [vmem:[#allocation4 + $0x48] sm:$0xf]  ;;  %v546_v35 = vld [vmem:[#allocation4 + $0x40] sm:$0xf] }
  0xcb   : > { %1028 = vmatprep.subr.msk.mxu0 %vm558_vm12, %v547_v33 }
  0xcc   : > { %1029 = vmatpush1.msk.msra.mxu0 %vm558_vm12, %v546_v35  ;;  %vm1493_vm12 = vmpackc.low %vm1248_vm14, %vm1390_vm1 }
  0xcd   : > { %1030 = vmatmul.mubr.msk.f32.vlgmr.msra.gmra.mrb[0].mxu0 %vm554_vm13, %v537_v36 }
  0xd1   : > { %v552_v37 = vpop.permute.xlu0 %551 }
  0xd5   : > { %v647_v47 = vpop.permute.xlu0 %646 }
  0xd9   : > { %v685_v50 = vpop.permute.xlu0 %684 }
 0x1a0   : > { %v631_v38 = vpop.f32.mrb[0].mxu0 }
 0x1a1   : > { %v632_v39 = vadd.f32 %v631_v38, %v552_v37  ;;  %v633_v40 = vpop.f32.mrb[1].mxu0 }
 0x1a2   : > { %v634_v41 = vadd.f32 %v633_v40, %v552_v37 }
 0x1a3   : > { %v1449_v42 = vmax.f32 %v632_v39, 0.0 }
 0x1a4   : > { %v1451_v43 = vmax.f32 %v634_v41, 0.0  ;;  %v800_v41 = vld [vmem:[%s1600_s3] sm:$0xff] }
 0x1a6   : > { %v1142_v44 = vpack.i.bf16 %v1451_v43, %v1449_v42  ;;  %v1152_v45 = vpack.i.bf16 %v1238_v0, %v1451_v43 }
 0x1a8   : > { %1143 = vrot.lane.b32.xlu0 %v1142_v44, %s1241_s24  ;;  %1133 = vrot.lane.b32.xlu1 %v1142_v44, %s1240_s23 }
 0x1ac   : > { %748 = vrot.lane.b32.xlu0 %v1449_v42, %s1244_s10  ;;  %1138 = vrot.lane.b32.xlu1 %v1142_v44, %s1242_s25 }
 0x1b0   : > { %1153 = vrot.lane.b32.xlu0 %v1152_v45, %s1243_s26  ;;  %1148 = vrot.lane.b32.xlu1 %v1142_v44, %s1239_s22  ;;  %s1032_s22 = sshll.u32 %s1316_s9, 4  ;;  %s1249_s9 = smov [#allocation6]  }
 0x1b1   : > { %s1178_s18 = sshll.u32 %s1249_s9, 4  ;;  %s1179_s18 = int_to_ptr.vmem [resolvable:$false] %s1178_s18 }
 0x1b2   : > { %s1180_s19 = scalar_lea.vmem %s1179_s18, 32 }
 0x1b4   : > { %1158 = vrot.lane.b32.xlu0 %v1152_v45, %s1244_s10  ;;  %728 = vrot.lane.b32.xlu1 %v1449_v42, %s1243_s26  ;;  %s1036_s26 = sshll.u32 %s1349_s17, 4  ;;  %s304_s17 = sand.u32 1, %s1228_s28  }
 0x1b5   : > { %s305_s23 = scalar_lea.vmem [#allocation6], %s304_s17  ;;  %s1555_s10 = scalar_lea.hbm %s1605_s8, %s1032_s22 }
 0x1b6   : > { %s940_s24 = sshll.u32 %s305_s23, 4  ;;  %s1557_s24 = int_to_ptr.vmem [resolvable:$true] %s940_s24 }
 0x1b7   : > { %p1181_p0 = scmp.lt.s32.totalorder %s1557_s24, %s1179_s18 }
 0x1b8   : > { %788 = vrot.lane.b32.xlu0 %v1451_v43, %s1246_s13  ;;  %1163 = vrot.lane.b32.xlu1 %v1152_v45, %s1245_s12 }
 0x1bc   : > { %786 = vrot.lane.b32.xlu0 %v1449_v42, %s1246_s13  ;;  %768 = vrot.lane.b32.xlu1 %v1449_v42, %s1245_s12  ;;  %s925_s12 = scalar_lea.sflag [#allocation7], %s304_s17 }
 0x1c0   : > { %790 = vrot.lane.b32.xlu1 %v1238_v0, %s1246_s13  ;;  %s315_s13 = scalar_lea.vmem %s1604_s7, %s1036_s26 }
 0x1c4   : > { %822 = vperm.xlu1 %1167, %v819_v46  }
 0x21a   : > { %v1144_v52 = vpop.permute.xlu0 %1143  ;;  %v1134_v53 = vpop.permute.xlu1 %1133 }
 0x21b   : > { %v1136_v54 = vunpack.i.h.bf16 %v1134_v53  ;;  %v1135_v55 = vunpack.i.l.bf16 %v1134_v53  ;;  %v1146_v60 = vunpack.i.h.bf16 %v1144_v52  ;;  %v1145_v61 = vunpack.i.l.bf16 %v1144_v52 }
 0x21d   : > { %v653_v0 = vsel %vm372_vm0, %v1135_v55, %v1136_v54  ;;  %v652_v1 = vsel %vm372_vm0, %v647_v47, %v1135_v55  ;;  %v690_v12 = vsel %vm411_vm3, %v685_v50, %v1145_v61  ;;  %v691_v13 = vsel %vm411_vm3, %v1145_v61, %v1146_v60  ;;  %vm1064_vm0 = vmpackc.low %vm1394_vm2, %vm1404_vm4 }
 0x21e   : > { %v749_v56 = vpop.permute.xlu0 %748  ;;  %v1139_v57 = vpop.permute.xlu1 %1138  ;;  %vm1067_vm3 = vmpackc.low %vm1390_vm1, %vm1418_vm7  ;;  %vm825_vm1 = vcmask 588800  }
 0x21f   : > { %v1141_v58 = vunpack.i.h.bf16 %v1139_v57  ;;  %v1140_v59 = vunpack.i.l.bf16 %v1139_v57  ;;  %vm1073_vm2 = vmpackc.low %vm1418_vm7, %vm1248_vm14 }
 0x221   : > { %v673_v62 = vsel %vm393_vm6, %v1140_v59, %v1141_v58  ;;  %v672_v2 = vsel %vm393_vm6, %v667_v49, %v1140_v59  ;;  %v916_v59 = vld [vmem:[%s1603_s6] sm:$0x1] }
 0x222   : > { %v1154_v3 = vpop.permute.xlu0 %1153  ;;  %v1149_v4 = vpop.permute.xlu1 %1148  ;;  %v1057_v5 = vpack.c.bf16 %v673_v62, %v653_v0  ;;  %v1060_v6 = vpack.c.bf16 %v672_v2, %v652_v1 }
 0x223   : > { %v1156_v8 = vunpack.i.h.bf16 %v1154_v3  ;;  %v1155_v9 = vunpack.i.l.bf16 %v1154_v3  ;;  %v1151_v10 = vunpack.i.h.bf16 %v1149_v4  ;;  %v1150_v11 = vunpack.i.l.bf16 %v1149_v4 }
 0x224   : > { %1059 = vmatprep.subr.msk.bf16.mxu1 %vm1484_vm15, %v1057_v5 }
 0x225   : > { %v735_v14 = vsel %vm463_vm8, %v1155_v9, %v1156_v8  ;;  %v710_v15 = vsel %vm431_vm5, %v705_v51, %v1150_v11  ;;  %v711_v16 = vsel %vm431_vm5, %v1150_v11, %v1151_v10  ;;  %1062 = vmatpush1.bf16.msk.msra.mxu1 %vm1493_vm12, %v1060_v6  ;;  %vm1070_vm5 = vmpackc.low %vm1404_vm4, %vm1248_vm14 }
 0x226   : > { %v1063_v17 = vpack.c.bf16 %v711_v16, %v691_v13  ;;  %v1066_v18 = vpack.c.bf16 %v710_v15, %v690_v12  ;;  %v1159_v19 = vpop.permute.xlu0 %1158  ;;  %v729_v20 = vpop.permute.xlu1 %728  ;;  %v1069_v21 = vpack.c.bf16 %v735_v14, %v1451_v43 }
 0x227   : > { %v734_v22 = vsel %vm463_vm8, %v729_v20, %v1155_v9  ;;  %v1161_v27 = vunpack.i.h.bf16 %v1159_v19  ;;  %v1160_v23 = vunpack.i.l.bf16 %v1159_v19 }
 0x228   : > { %1065 = vmatprep.subr.msk.bf16.mxu1 %vm1064_vm0, %v1063_v17  ;;  %v1072_v26 = vpack.c.bf16 %v734_v22, %v1449_v42 }
 0x229   : > { %1068 = vmatpush1.bf16.msk.msra.mxu1 %vm1067_vm3, %v1066_v18  ;;  %v755_v30 = vsel %vm489_vm9, %v1160_v23, %v1161_v27  ;;  %v754_v35 = vsel %vm489_vm9, %v749_v56, %v1160_v23 }
 0x22a   : > { %v1164_v24 = vpop.permute.xlu1 %1163  ;;  %1071 = vmatprep.subr.msk.bf16.mxu1 %vm1070_vm5, %v1069_v21  ;;  %v789_v29 = vpop.permute.xlu0 %788 }
 0x22b   : > { %v1166_v25 = vunpack.i.h.bf16 %v1164_v24  ;;  %v1165_v28 = vunpack.i.l.bf16 %v1164_v24 }
 0x22d   : > { %v775_v31 = vsel %vm510_vm10, %v1165_v28, %v1166_v25  ;;  %1074 = vmatpush1.bf16.msk.msra.mxu1 %vm1073_vm2, %v1072_v26 }
 0x22e   : > { %v1075_v32 = vpack.c.bf16 %v775_v31, %v755_v30  ;;  %v769_v33 = vpop.permute.xlu1 %768  ;;  %v787_v38 = vpop.permute.xlu0 %786 }
 0x22f   : > { %v774_v36 = vsel %vm510_vm10, %v769_v33, %v1165_v28  ;;  %v792_v42 = vsel %vm528_vm11, %v787_v38, %v789_v29 }
 0x230   : > { %v1078_v37 = vpack.c.bf16 %v774_v36, %v754_v35  ;;  %1077 = vmatprep.subr.msk.bf16.mxu1 %vm1484_vm15, %v1075_v32 }
 0x232   : > { %v791_v39 = vpop.permute.xlu1 %790  ;;  %1080 = vmatpush1.bf16.msk.msra.mxu1 %vm1493_vm12, %v1078_v37 }
 0x233   : > { %v793_v40 = vsel %vm528_vm11, %v789_v29, %v791_v39 }
 0x234   : > { %1047 = vmatprep.subr.msk.mxu1 %vm1404_vm4, %v793_v40 }
 0x236   : > { %1048 = vmatpush1.msk.msra.mxu1 %vm1418_vm7, %v792_v42 }
 0x237   : > { %1031 = vmatmul.mubr.msk.f32.vlgmr.msra.gmra.mrb[0].mxu1 %vm825_vm1, %v800_v41 }
 0x243   : > { %v823_v43 = vpop.permute.xlu1 %822 }
 0x30a   : > { %v895_v44 = vpop.f32.mrb[0].mxu1 }
 0x30b   : > { %v896_v34 = vadd.f32 %v895_v44, %v823_v43  ;;  %v897_v45 = vpop.f32.mrb[1].mxu1 }
 0x30c   : > { %v898_v46 = vadd.f32 %v897_v45, %v823_v43 }
 0x30d   : > { %900 = vst [vmem:[%s315_s13] sm:$0xff] %v896_v34  ;;  %v902_v47 = vmax.f32 %v896_v34, 0.0 }
 0x30e   : > { %901 = vst [vmem:[%s315_s13 + $0x8] sm:$0xff] %v898_v46  ;;  %v903_v49 = vmax.f32 %v898_v46, 0.0  ;;  %s1174_s13 = scalar_lea.vmem %s1557_s24, 16 }
 0x30f   : > { %p1175_p11 = scmp.ne.s32.totalorder %s1557_s24, %s1174_s13  ;;  %p1182_p1 = scmp.lt.s32.totalorder %s1180_s19, %s1174_s13 }
 0x310   : > { %v904_v50 = vadd.f32 %v903_v49, %v902_v47 }
 0x311   : > { %p1176_p12 = pnand %p1175_p11, %p1333_p5  ;;  %p1183_p2 = por %p1182_p1, %p1181_p0 }
 0x312   : > { %905 = vadd.xlane.f32.xlu0 %v904_v50 }
 0x313   : > { %p1177_p13 = pneg %p1176_p12 }
 0x315   : > { %p1184_p3 = pnand %p1183_p2, %p1177_p13 }
 0x39f   : > { %v906_v51 = vpop.xlane.xlu0 %905 }
 0x3a0   : > { %v907_v52 = vmul.f32 0.00390625, %v906_v51 }
 0x3a2   : > { %v909_v53 = vmul.f32 %v908_v48, %v907_v52 }
 0x3a4   : > { %v910_v54 = vrot.slane %v909_v53, 4 }
 0x3a6   : > { %v911_v55 = vadd.f32 %v910_v54, %v909_v53 }
 0x3a8   : > { %v912_v56 = vrot.slane %v911_v55, 2 }
 0x3aa   : > { %v913_v57 = vadd.f32 %v912_v56, %v911_v55 }
 0x3ac   : > { %v914_v58 = vrot.slane %v913_v57, 1 }
 0x3ae   : > { %v915_v60 = vadd.f32 %v914_v58, %v913_v57 }
 0x3b0   : > { %v917_v61 = vadd.f32 %v916_v59, %v915_v60 }
 0x3b2   : > { %918 = vst [vmem:[%s305_s23] sm:$0x1] %v917_v61 }
 0x3b3   : > { %1187 = shalt.err (!%p1184_p3)
}
 0x3b4   : > { %s1188_s17 = scalar_lea.hbm %s1555_s10, 16  ;;  %s1192_s22 = scalar_lea.hbm %s1605_s8, 32 }
 0x3b5   : > { %p1189_p4 = scmp.ne.s32.totalorder %s1555_s10, %s1188_s17  ;;  %p1193_p9 = scmp.lt.u32.totalorder %s1555_s10, %s1605_s8 }
 0x3b6   : > { %p1194_p10 = scmp.lt.u32.totalorder %s1192_s22, %s1188_s17  ;;  %p1196_p12 = scmp.lt.u32.totalorder %s1188_s17, %s1555_s10 }
 0x3b7   : > { %p1190_p7 = pnand %p1189_p4, %p1333_p5 }
 0x3b8   : > { %p1195_p11 = por %p1194_p10, %p1193_p9 }
 0x3b9   : > { %p1191_p8 = pneg %p1190_p7 }
 0x3ba   : > { %p1197_p13 = por %p1196_p12, %p1195_p11 }
 0x3bc   : > { %p1198_p0 = pnand %p1197_p13, %p1191_p8 }
 0x3be   : > { %1201 = shalt.err (!%p1198_p0)
}
 0x3bf   : > { %1081 = dma.vmem_to_hbm [thread:$0]  (%p1333_p5), %s1557_s24, 16, %s1555_s10, %s925_s12  }
 0x3c0 PF: > { %p1087_p1 = scmp.ge.s32.totalorder %s1236_s30, 2  ;;  %s960_s26 = sand.u32 1, %s1224_s27  }
 0x3c1   : > { %s961_s13 = scalar_lea.sflag [#allocation7], %s960_s26 }
 0x3c2   : > { %p1084_p2 = pnand %p1087_p1, %p1337_p6 }
 0x3c4   : > { %1219 = dma.done.wait (!%p1084_p2), %s961_s13, 16  }
 0x3c5   : > { %1221 = vsyncadd (!%p1084_p2), %s961_s13, 4294967280  ;;  %p19_p3 = scmp.ge.s32.totalorder %s1320_s11, 4   ;;  %s1620_s27 = smov %s1228_s28 }
 0x3c6   : > { %s1621_s28 = smov %s1232_s29  ;;  %s1622_s29 = smov %s1331_s14 }
 0x3c7   : > { %s1623_s30 = smov %s1320_s11  ;;  %21 = sbr.rel (!%p19_p3) target bundleno = 3 (0x3), region = 95 }
 0x3ce   :  { %965 = vsyncpa [#allocation7], 1 }
 0x3cf   :  { %967 = vsyncpa [#allocation7 + $0x1], 1 }

</bundles_post_ra>
